<compile_context>
chip_gen: v7x
topology: tpu7x:2x2x1
jax: 0.10.0
libtpu: 0.0.40
codegen_flags: <defaults>
</compile_context>

<pallas_src>
import functools

import jax
import jax.numpy as jnp
from jax.experimental import pallas as pl
from jax.experimental.pallas import tpu as pltpu


def _gated_conv_kernel(patch_ref, w_ref, out_ref):
    """One grid step = one block of B samples.

    patch_ref : (B, CKKp, HW)  im2col patches (contraction dim zero-padded)
    w_ref     : (2*O, CKKp)    rows [0:O] = conv weight, rows [O:2O] = gate weight
    out_ref   : (B, O, HW)     lane-dense output (HW on the lane axis)
    """
    B, n_out, hw = out_ref.shape
    inv_cnt = 1.0 / float(n_out * hw)   # true (unpadded) element count per tensor
    eps = 1e-5

    w = w_ref[...]                      # hoisted: loaded once per grid step

    for b in range(B):                  # B is small & static -> unrolled
        # Fused conv+gate matmul: one MXU push, lane-dense [2O, HW], f32 accum.
        cg = jnp.dot(w, patch_ref[b], preferred_element_type=jnp.float32)

        # One-pass statistics: one lane reduction over the fused result for
        # sum and one for sum-of-squares (instead of 2x two-pass mean/var).
        row_s1 = jnp.sum(cg, axis=1, keepdims=True)        # [2O, 1]
        row_s2 = jnp.sum(cg * cg, axis=1, keepdims=True)   # [2O, 1]

        c = cg[:n_out]
        g = cg[n_out:]
        c_mean = jnp.sum(row_s1[:n_out]) * inv_cnt
        g_mean = jnp.sum(row_s1[n_out:]) * inv_cnt
        c_var = jnp.maximum(jnp.sum(row_s2[:n_out]) * inv_cnt - c_mean * c_mean, 0.0)
        g_var = jnp.maximum(jnp.sum(row_s2[n_out:]) * inv_cnt - g_mean * g_mean, 0.0)

        c_n = (c - c_mean) * jax.lax.rsqrt(c_var + eps)
        g_n = (g - g_mean) * jax.lax.rsqrt(g_var + eps)

        out_ref[b] = (jnp.tanh(c_n) * jax.nn.sigmoid(g_n)).astype(out_ref.dtype)


def _im2col_nchw(x, K, padding):
    """x: [N, C, H, W] -> patches [N, C*K*K, H*W] (stride=1, dilation=1).

    (c, ki, kj) ordering matches w.reshape(O, C*K*K); the spatial axis lands
    last (lane axis), so no transpose is needed anywhere.
    """
    N, C, H, W = x.shape
    xp = jnp.pad(x, ((0, 0), (0, 0), (padding, padding), (padding, padding)))
    cols = [xp[:, :, i:i + H, j:j + W] for i in range(K) for j in range(K)]
    p = jnp.stack(cols, axis=2)               # [N, C, K*K, H, W]
    return p.reshape(N, C * K * K, H * W)     # [N, CKK, HW]


@functools.partial(jax.jit, static_argnames=("kernel", "padding", "use_bf16"))
def layer_with_attention(x, w_conv, w_gate, *, kernel, padding, use_bf16=True):
    """x: [N, C, H, W]; w_conv/w_gate: [O, C, K, K] (no bias). Returns NCHW."""
    N, C, H, W = x.shape
    O = w_conv.shape[0]
    K = kernel
    HW = H * W
    CKK = C * K * K
    CKKp = ((CKK + 7) // 8) * 8         # sublane-align the contraction dim

    # Samples per grid step: amortize per-step pipeline overhead while keeping
    # the parallel grid extent >= 2 (v7x: 2 TensorCores). Blocks stay tiny
    # relative to the 32 MiB scoped VMEM default on v7x.
    B = max(1, min(8, N // 2))
    nb = pl.cdiv(N, B)
    N_pad = nb * B

    patches = _im2col_nchw(x, K, padding)                          # [N, CKK, HW]
    patches = jnp.pad(patches, ((0, N_pad - N), (0, CKKp - CKK), (0, 0)))
    w_all = jnp.concatenate(
        [w_conv.reshape(O, CKK), w_gate.reshape(O, CKK)], axis=0)  # [2O, CKK]
    w_all = jnp.pad(w_all, ((0, 0), (0, CKKp - CKK)))

    if use_bf16:
        # bf16 MXU inputs (v6e/v7x); all post-matmul math remains f32 in-kernel.
        patches = patches.astype(jnp.bfloat16)
        w_all = w_all.astype(jnp.bfloat16)

    out = pl.pallas_call(
        _gated_conv_kernel,
        out_shape=jax.ShapeDtypeStruct((N_pad, O, HW), jnp.float32),
        grid_spec=pltpu.PrefetchScalarGridSpec(
            num_scalar_prefetch=0,
            grid=(nb,),
            in_specs=[
                pl.BlockSpec((B, CKKp, HW), lambda i: (i, 0, 0)),
                # Weights are a few KiB and grid-invariant; double-buffering
                # them costs negligible VMEM at these shapes, so pipeline_mode
                # is left at its default.
                pl.BlockSpec((2 * O, CKKp), lambda i: (0, 0)),
            ],
            out_specs=pl.BlockSpec((B, O, HW), lambda i: (i, 0, 0)),
        ),
        compiler_params=pltpu.CompilerParams(
            dimension_semantics=("parallel",)),
    )(patches, w_all)                                              # [N_pad, O, HW]

    return out[:N].reshape(N, O, H, W)                             # already NCHW


def _reference(x, w_conv, w_gate, padding):
    """Pure-JAX reference for sanity check."""
    dn = jax.lax.conv_dimension_numbers(x.shape, w_conv.shape,
                                        ("NCHW", "OIHW", "NCHW"))

    def conv(w):
        return jax.lax.conv_general_dilated(
            x, w, window_strides=(1, 1),
            padding=[(padding, padding), (padding, padding)],
            dimension_numbers=dn)

    def sample_norm(t):
        m = jnp.mean(t, axis=(1, 2, 3), keepdims=True)
        v = jnp.mean((t - m) ** 2, axis=(1, 2, 3), keepdims=True)
        return (t - m) / jnp.sqrt(v + 1e-5)

    c = sample_norm(conv(w_conv))
    g = sample_norm(conv(w_gate))
    return jnp.tanh(c) * jax.nn.sigmoid(g)


if __name__ == "__main__":
    N, C_in, C_out, H, W = 2, 4, 8, 16, 16
    K, PAD = 3, 1

    key = jax.random.PRNGKey(0)
    kx, kc, kg = jax.random.split(key, 3)
    x = jax.random.normal(kx, (N, C_in, H, W), dtype=jnp.float32)
    fan_in = C_in * K * K
    w_conv = jax.random.normal(kc, (C_out, C_in, K, K), jnp.float32) / jnp.sqrt(fan_in)
    w_gate = jax.random.normal(kg, (C_out, C_in, K, K), jnp.float32) / jnp.sqrt(fan_in)

    ref = jax.block_until_ready(_reference(x, w_conv, w_gate, PAD))

    # f32 MXU path: strict check against the conv reference.
    out_f32 = jax.block_until_ready(
        layer_with_attention(x, w_conv, w_gate, kernel=K, padding=PAD,
                             use_bf16=False))
    assert out_f32.shape == (N, C_out, H, W), out_f32.shape
    assert jnp.allclose(out_f32, ref, atol=1e-4, rtol=1e-4), float(
        jnp.max(jnp.abs(out_f32 - ref)))

    # bf16 MXU path (default, per perf feedback): f32 epilogue, looser tolerance.
    out_bf16 = jax.block_until_ready(
        layer_with_attention(x, w_conv, w_gate, kernel=K, padding=PAD,
                             use_bf16=True))
    assert out_bf16.shape == (N, C_out, H, W), out_bf16.shape
    assert jnp.allclose(out_bf16, ref, atol=2e-2, rtol=2e-2), float(
        jnp.max(jnp.abs(out_bf16 - ref)))

    print("KERNEL_OK")
</pallas_src>

<mosaic_0001>
module attributes {stable_mosaic.version = 11 : i64} {
  func.func @_gated_conv_kernel(%arg0: i32, %arg1: memref<1x40x256xf32, #tpu.memory_space<vmem>>, %arg2: memref<16x40xf32, #tpu.memory_space<vmem>>, %arg3: memref<1x8x256xf32, #tpu.memory_space<vmem>>) attributes {dimension_semantics = [#tpu.dimension_semantics<parallel>], iteration_bounds = array<i64: 2>, scalar_prefetch = 0 : i64, scratch_operands = 0 : i64, tpu.core_type = #tpu.core_type<tc>, window_params = [{transform_indices = @transform_0, window_bounds = array<i64: 1, 40, 256>}, {pipeline_mode = #tpu.pipeline_mode<synchronous>, transform_indices = @transform_1, window_bounds = array<i64: 16, 40>}, {transform_indices = @transform_2, window_bounds = array<i64: 1, 8, 256>}]} {
    %c0 = arith.constant 0 : index
    %c0_0 = arith.constant 0 : index
    %0 = vector.load %arg2[%c0, %c0_0] : memref<16x40xf32, #tpu.memory_space<vmem>>, vector<16x40xf32>
    %c0_1 = arith.constant 0 : index
    %c0_2 = arith.constant 0 : index
    %c0_3 = arith.constant 0 : index
    %1 = vector.load %arg1[%c0_1, %c0_2, %c0_3] : memref<1x40x256xf32, #tpu.memory_space<vmem>>, vector<1x40x256xf32>
    %2 = vector.shape_cast %1 : vector<1x40x256xf32> to vector<40x256xf32>
    %cst = arith.constant dense<0.000000e+00> : vector<16x256xf32>
    %3 = tpu.matmul %0, %2, %cst {dimension_numbers = #tpu.dot_dimension_numbers<[1], [0], [0], [1], [0, 0, 1, 1], [], []>} : vector<16x40xf32>, vector<40x256xf32>, vector<16x256xf32> -> vector<16x256xf32>
    %cst_4 = arith.constant dense<0.000000e+00> : vector<16xf32>
    %4 = vector.multi_reduction <add>, %3, %cst_4 [1] : vector<16x256xf32> to vector<16xf32>
    %5 = vector.shape_cast %4 : vector<16xf32> to vector<16x1xf32>
    %6 = arith.mulf %3, %3 : vector<16x256xf32>
    %cst_5 = arith.constant dense<0.000000e+00> : vector<16xf32>
    %7 = vector.multi_reduction <add>, %6, %cst_5 [1] : vector<16x256xf32> to vector<16xf32>
    %8 = vector.shape_cast %7 : vector<16xf32> to vector<16x1xf32>
    %9 = vector.extract_strided_slice %3 {offsets = [0, 0], sizes = [8, 256], strides = [1, 1]} : vector<16x256xf32> to vector<8x256xf32>
    %10 = vector.extract_strided_slice %3 {offsets = [8, 0], sizes = [8, 256], strides = [1, 1]} : vector<16x256xf32> to vector<8x256xf32>
    %11 = vector.extract_strided_slice %5 {offsets = [0, 0], sizes = [8, 1], strides = [1, 1]} : vector<16x1xf32> to vector<8x1xf32>
    %12 = vector.shape_cast %11 : vector<8x1xf32> to vector<1x8x1xf32>
    %cst_6 = arith.constant dense<0.000000e+00> : vector<1xf32>
    %13 = vector.multi_reduction <add>, %12, %cst_6 [1, 2] : vector<1x8x1xf32> to vector<1xf32>
    %14 = vector.shape_cast %13 : vector<1xf32> to vector<1x1x1xf32>
    %15 = vector.extract %14[0, 0, 0] : f32 from vector<1x1x1xf32>
    %cst_7 = arith.constant 4.8828125E-4 : f32
    %16 = arith.mulf %15, %cst_7 : f32
    %17 = vector.extract_strided_slice %5 {offsets = [8, 0], sizes = [8, 1], strides = [1, 1]} : vector<16x1xf32> to vector<8x1xf32>
    %18 = vector.shape_cast %17 : vector<8x1xf32> to vector<1x8x1xf32>
    %cst_8 = arith.constant dense<0.000000e+00> : vector<1xf32>
    %19 = vector.multi_reduction <add>, %18, %cst_8 [1, 2] : vector<1x8x1xf32> to vector<1xf32>
    %20 = vector.shape_cast %19 : vector<1xf32> to vector<1x1x1xf32>
    %21 = vector.extract %20[0, 0, 0] : f32 from vector<1x1x1xf32>
    %cst_9 = arith.constant 4.8828125E-4 : f32
    %22 = arith.mulf %21, %cst_9 : f32
    %23 = vector.extract_strided_slice %8 {offsets = [0, 0], sizes = [8, 1], strides = [1, 1]} : vector<16x1xf32> to vector<8x1xf32>
    %24 = vector.shape_cast %23 : vector<8x1xf32> to vector<1x8x1xf32>
    %cst_10 = arith.constant dense<0.000000e+00> : vector<1xf32>
    %25 = vector.multi_reduction <add>, %24, %cst_10 [1, 2] : vector<1x8x1xf32> to vector<1xf32>
    %26 = vector.shape_cast %25 : vector<1xf32> to vector<1x1x1xf32>
    %27 = vector.extract %26[0, 0, 0] : f32 from vector<1x1x1xf32>
    %cst_11 = arith.constant 4.8828125E-4 : f32
    %28 = arith.mulf %27, %cst_11 : f32
    %29 = arith.mulf %16, %16 : f32
    %30 = arith.subf %28, %29 : f32
    %cst_12 = arith.constant 0.000000e+00 : f32
    %31 = arith.maximumf %30, %cst_12 : f32
    %32 = vector.extract_strided_slice %8 {offsets = [8, 0], sizes = [8, 1], strides = [1, 1]} : vector<16x1xf32> to vector<8x1xf32>
    %33 = vector.shape_cast %32 : vector<8x1xf32> to vector<1x8x1xf32>
    %cst_13 = arith.constant dense<0.000000e+00> : vector<1xf32>
    %34 = vector.multi_reduction <add>, %33, %cst_13 [1, 2] : vector<1x8x1xf32> to vector<1xf32>
    %35 = vector.shape_cast %34 : vector<1xf32> to vector<1x1x1xf32>
    %36 = vector.extract %35[0, 0, 0] : f32 from vector<1x1x1xf32>
    %cst_14 = arith.constant 4.8828125E-4 : f32
    %37 = arith.mulf %36, %cst_14 : f32
    %38 = arith.mulf %22, %22 : f32
    %39 = arith.subf %37, %38 : f32
    %cst_15 = arith.constant 0.000000e+00 : f32
    %40 = arith.maximumf %39, %cst_15 : f32
    %41 = vector.broadcast %16 : f32 to vector<8x256xf32>
    %42 = arith.subf %9, %41 : vector<8x256xf32>
    %cst_16 = arith.constant 9.99999974E-6 : f32
    %43 = arith.addf %31, %cst_16 : f32
    %44 = math.rsqrt %43 : f32
    %45 = vector.broadcast %44 : f32 to vector<8x256xf32>
    %46 = arith.mulf %42, %45 : vector<8x256xf32>
    %47 = vector.broadcast %22 : f32 to vector<8x256xf32>
    %48 = arith.subf %10, %47 : vector<8x256xf32>
    %cst_17 = arith.constant 9.99999974E-6 : f32
    %49 = arith.addf %40, %cst_17 : f32
    %50 = math.rsqrt %49 : f32
    %51 = vector.broadcast %50 : f32 to vector<8x256xf32>
    %52 = arith.mulf %48, %51 : vector<8x256xf32>
    %53 = math.tanh %46 : vector<8x256xf32>
    %54 = arith.negf %52 : vector<8x256xf32>
    %55 = math.exp %54 : vector<8x256xf32>
    %cst_18 = arith.constant 1.000000e+00 : f32
    %56 = vector.broadcast %cst_18 : f32 to vector<8x256xf32>
    %57 = arith.addf %56, %55 : vector<8x256xf32>
    %58 = arith.divf %56, %57 : vector<8x256xf32>
    %59 = arith.mulf %53, %58 : vector<8x256xf32>
    %c0_19 = arith.constant 0 : index
    %c0_20 = arith.constant 0 : index
    %c0_21 = arith.constant 0 : index
    %60 = vector.load %arg3[%c0_19, %c0_20, %c0_21] : memref<1x8x256xf32, #tpu.memory_space<vmem>>, vector<1x8x256xf32>
    %61 = vector.shape_cast %60 : vector<1x8x256xf32> to vector<8x256xf32>
    %62 = vector.shape_cast %59 : vector<8x256xf32> to vector<1x8x256xf32>
    tpu.vector_store %arg3[%c0_19, %c0_20, %c0_21], %62 {strides = array<i32>} : memref<1x8x256xf32, #tpu.memory_space<vmem>>, vector<1x8x256xf32>,
    return
  }
  func.func @transform_0(%arg0: i32) -> (i32, i32, i32) {
    %c0_i32 = arith.constant 0 : i32
    %c0_i32_0 = arith.constant 0 : i32
    %c0_i32_1 = arith.constant 0 : i32
    return %arg0, %c0_i32, %c0_i32_0 : i32, i32, i32
  }
  func.func @transform_1(%arg0: i32) -> (i32, i32) {
    %c0_i32 = arith.constant 0 : i32
    %c0_i32_0 = arith.constant 0 : i32
    %c0_i32_1 = arith.constant 0 : i32
    return %c0_i32, %c0_i32_0 : i32, i32
  }
  func.func @transform_2(%arg0: i32) -> (i32, i32, i32) {
    %c0_i32 = arith.constant 0 : i32
    %c0_i32_0 = arith.constant 0 : i32
    %c0_i32_1 = arith.constant 0 : i32
    return %arg0, %c0_i32, %c0_i32_0 : i32, i32, i32
  }
}

</mosaic_0001>

<bundles_post_ra>
// kernel: layer_with_attention.1
= control target key start
LH: loop header
LB: loop body
LE: loop exit
PB: predicated region body
PF: predicated region fallthrough
CT: control target
= control target key end

     0   :  { %s493_s9 = smov 0   ;;  %s544_s0 = inlined_call_operand.vmem [shape: f32[2,40,256], index: 0, kind: input, shape index: {}]   ;;  %s545_s1 = inlined_call_operand.vmem [shape: f32[16,40], index: 1, kind: input, shape index: {}]   ;;  %s546_s2 = inlined_call_operand.vmem [shape: f32[2,8,256], index: 2, kind: output, shape index: {}]  }
   0x1 LB: > { %s400_s10 = sadd.s32 4294967295, %s474_s9   ;;  %p404_p0 = scmp.ge.s32.totalorder %s474_s9, 1  ;;  %s474_s9 = sphi %s493_s9, %s12_s9  }
   0x2   : > { %p112_p1 = scmp.lt.s32.totalorder %s474_s9, 3 }
   0x4   : > { %p113_p2 = pnand %p404_p0, %p112_p1 }
   0x5   : > { %p134_p3 = scmp.lt.s32.totalorder (!%p113_p2), %s400_s10, 1  ;;  %v476_v0 = vmov (!%p113_p2), 0.0   ;;  %v144_v15 = vld [vmem:[%s545_s1] sm:$0xff] (!%p113_p2)  ;;  %vm156_vm0 = vcmask (!%p113_p2), 326656   ;;  %v145_v16 = vld [vmem:[%s545_s1 + $0x8] sm:$0xff] (!%p113_p2)  ;;  %vm256_vm1 = vcmask (!%p113_p2), 7168  }
   0x6   : > { %116 = sbr.rel (%p113_p2) target bundleno = 703 (0x2bf), region = 28  ;;  %227 = vmatprep.mubr.f32.mxu0 (!%p113_p2), %v476_v0  ;;  %233 = vmatprep.mubr.f32.mxu1 (!%p113_p2), %v476_v0  ;;  %s477_s30 = smov (!%p113_p2), 0.0  }
   0xd   : > { %s548_s10 = smov (!%p134_p3, %s400_s10), 1 }
   0xe   : > { %s429_s11 = smul.u32 80, %s548_s10  ;;  %s414_s12 = sshll.u32 %s548_s10, 4 }
   0xf   : > { %s143_s15 = scalar_lea.vmem %s546_s2, %s414_s12 }
  0x10   : > { %s138_s14 = scalar_lea.vmem %s544_s0, %s429_s11 }
  0x11   : > { %v147_v1 = vld [vmem:[%s138_s14 + $0x8] sm:$0xff]  ;;  %v149_v2 = vld [vmem:[%s138_s14 + $0x18] sm:$0xff]  ;;  %v146_v3 = vld [vmem:[%s138_s14] sm:$0xff] }
  0x12   : > { %v415_v4 = vpack.c.bf16 %v149_v2, %v147_v1  ;;  %v148_v5 = vld [vmem:[%s138_s14 + $0x10] sm:$0xff]  ;;  %v151_v6 = vld [vmem:[%s138_s14 + $0x28] sm:$0xff]  ;;  %v153_v7 = vld [vmem:[%s138_s14 + $0x38] sm:$0xff] }
  0x13   : > { %v417_v8 = vpack.c.bf16 %v148_v5, %v146_v3  ;;  %v419_v9 = vpack.c.bf16 %v153_v7, %v151_v6  ;;  %v150_v10 = vld [vmem:[%s138_s14 + $0x20] sm:$0xff]  ;;  %v152_v11 = vld [vmem:[%s138_s14 + $0x30] sm:$0xff]  ;;  %v155_v13 = vld [vmem:[%s138_s14 + $0x48] sm:$0xff] }
  0x14   : > { %416 = vmatprep.subr.bf16.mxu0 %v415_v4  ;;  %423 = vmatprep.subr.bf16.mxu1 %v415_v4  ;;  %v421_v12 = vpack.c.bf16 %v152_v11, %v150_v10  ;;  %v154_v14 = vld [vmem:[%s138_s14 + $0x40] sm:$0xff] }
  0x15   : > { %418 = vmatpush1.bf16.msra.mxu0 %v417_v8  ;;  %426 = vmatpush1.bf16.msra.mxu1 %v417_v8 }
  0x16   : > { %420 = vmatprep.subr.bf16.mxu0 %v419_v9  ;;  %424 = vmatprep.subr.bf16.mxu1 %v419_v9 }
  0x19   : > { %422 = vmatpush1.bf16.msra.mxu0 %v421_v12  ;;  %427 = vmatpush1.bf16.msra.mxu1 %v421_v12 }
  0x1a   : > { %171 = vmatprep.subr.mxu0 %v155_v13  ;;  %425 = vmatprep.subr.mxu1 %v155_v13 }
  0x1d   : > { %172 = vmatpush1.msra.mxu0 %v154_v14  ;;  %428 = vmatpush1.msra.mxu1 %v154_v14 }
  0x1e   : > { %408 = vmatmul.mubr.msk.f32.vlgmr.msra.gmra.mrb[0].mxu0 %vm156_vm0, %v144_v15  ;;  %409 = vmatmul.mubr.msk.f32.vlgmr.msra.gmra.mrb[0].mxu1 %vm156_vm0, %v145_v16 }
  0xf1   : > { %v513_v17 = vpop.f32.mrb[0].mxu0  ;;  %v515_v18 = vpop.f32.mrb[0].mxu1 }
  0xf2   : > { %v517_v19 = vpop.f32.mrb[1].mxu0  ;;  %v519_v20 = vpop.f32.mrb[1].mxu1  ;;  %v246_v21 = vmul.f32 %v513_v17, %v513_v17  ;;  %v248_v22 = vmul.f32 %v515_v18, %v515_v18 }
  0xf3   : > { %v247_v23 = vmul.f32 %v517_v19, %v517_v19  ;;  %v249_v24 = vmul.f32 %v519_v20, %v519_v20  ;;  %v240_v25 = vadd.f32 %v517_v19, %v513_v17  ;;  %v243_v26 = vadd.f32 %v519_v20, %v515_v18 }
  0xf5   : > { %241 = vadd.xlane.f32.xlu0 %v240_v25  ;;  %v250_v27 = vadd.f32 %v247_v23, %v246_v21  ;;  %v253_v28 = vadd.f32 %v249_v24, %v248_v22 }
  0xf7   : > { %251 = vadd.xlane.f32.xlu1 %v250_v27 }
  0xf9   : > { %244 = vadd.xlane.f32.xlu0 %v243_v26 }
  0xfb   : > { %254 = vadd.xlane.f32.xlu1 %v253_v28 }
 0x182   : > { %v242_v29 = vpop.xlane.xlu0 %241 }
 0x183   : > { %v257_v30 = vsel %vm256_vm1, %v242_v29, 0.0 }
 0x184   : > { %v252_v31 = vpop.xlane.xlu1 %251  ;;  %258 = vadd.xlane.f32.xlu0 %v257_v30 }
 0x185   : > { %v279_v33 = vsel %vm256_vm1, %v252_v31, 0.0 }
 0x186   : > { %v245_v32 = vpop.xlane.xlu0 %244 }
 0x187   : > { %v268_v34 = vsel %vm256_vm1, %v245_v32, 0.0 }
 0x188   : > { %v255_v35 = vpop.xlane.xlu1 %254  ;;  %280 = vadd.xlane.f32.xlu0 %v279_v33  ;;  %269 = vadd.xlane.f32.xlu1 %v268_v34 }
 0x189   : > { %v293_v36 = vsel %vm256_vm1, %v255_v35, 0.0 }
 0x18c   : > { %294 = vadd.xlane.f32.xlu1 %v293_v36 }
 0x211   : > { %v259_v37 = vpop.xlane.xlu0 %258 }
 0x212   : > { %v260_v38 = vrot.slane %v259_v37, 4 }
 0x214   : > { %v261_v39 = vadd.f32 %v260_v38, %v259_v37 }
 0x215   : > { %v270_v40 = vpop.xlane.xlu1 %269  ;;  %v281_v41 = vpop.xlane.xlu0 %280 }
 0x216   : > { %v262_v42 = vrot.slane %v261_v39, 2  ;;  %v271_v43 = vrot.slane %v270_v40, 4  ;;  %v282_v44 = vrot.slane %v281_v41, 4 }
 0x218   : > { %v272_v45 = vadd.f32 %v271_v43, %v270_v40  ;;  %v283_v46 = vadd.f32 %v282_v44, %v281_v41  ;;  %v263_v47 = vadd.f32 %v262_v42, %v261_v39 }
 0x219   : > { %v295_v48 = vpop.xlane.xlu1 %294 }
 0x21a   : > { %v273_v49 = vrot.slane %v272_v45, 2  ;;  %v284_v50 = vrot.slane %v283_v46, 2  ;;  %v296_v51 = vrot.slane %v295_v48, 4  ;;  %v264_v52 = vrot.slane %v263_v47, 1 }
 0x21c   : > { %v285_v53 = vadd.f32 %v284_v50, %v283_v46  ;;  %v297_v54 = vadd.f32 %v296_v51, %v295_v48  ;;  %v265_v55 = vadd.f32 %v264_v52, %v263_v47  ;;  %v274_v56 = vadd.f32 %v273_v49, %v272_v45 }
 0x21e   : > { %v298_v57 = vrot.slane %v297_v54, 2  ;;  %430 = vpush %v265_v55  ;;  %v275_v58 = vrot.slane %v274_v56, 1  ;;  %v286_v59 = vrot.slane %v285_v53, 1 }
 0x220   : > { %v299_v60 = vadd.f32 %v298_v57, %v297_v54  ;;  %v276_v61 = vadd.f32 %v275_v58, %v274_v56  ;;  %v287_v62 = vadd.f32 %v286_v59, %v285_v53 }
 0x222   : > { %432 = vpush %v276_v61  ;;  %v300_v63 = vrot.slane %v299_v60, 1 }
 0x223   : > { %434 = vpush %v287_v62 }
 0x224   : > { %v301_v0 = vadd.f32 %v300_v63, %v299_v60 }
 0x226   : > { %436 = vpush %v301_v0 }
 0x24f   : > { %s431_s19 = spop %430 }
 0x250   : > { %s267_s20 = smul.f32 0.00048828125, %s431_s19 }
 0x252   : > { %v307_v1 = vstv %s267_s20  ;;  %s290_s21 = smul.f32 %s267_s20, %s267_s20 }
 0x253   : > { %s433_s22 = spop %432  ;;  %v308_v2 = vsub.f32 %v513_v17, %v307_v1  ;;  %v309_v3 = vsub.f32 %v517_v19, %v307_v1 }
 0x254   : > { %s278_s23 = smul.f32 0.00048828125, %s433_s22  ;;  %s435_s24 = spop %434 }
 0x255   : > { %s289_s25 = smul.f32 0.00048828125, %s435_s24 }
 0x256   : > { %v317_v4 = vstv %s278_s23  ;;  %s304_s29 = smul.f32 %s278_s23, %s278_s23 }
 0x257   : > { %s291_s26 = ssub.f32 %s289_s25, %s290_s21  ;;  %s437_s27 = spop %436  ;;  %v318_v5 = vsub.f32 %v515_v18, %v317_v4  ;;  %v319_v6 = vsub.f32 %v519_v20, %v317_v4 }
 0x258   : > { %s303_s28 = smul.f32 0.00048828125, %s437_s27 }
 0x259   : > { %s292_s3 = smax.f32 %s477_s30, %s291_s26 }
 0x25a   : > { %s310_s4 = sadd.f32 1e-05, %s292_s3 }
 0x25b   : > { %s305_s5 = ssub.f32 %s303_s28, %s304_s29 }
 0x25c   : > { %v311_v7 = vstv %s310_s4 }
 0x25d   : > { %452 = vrsqrt.f32 %v311_v7  ;;  %s306_s6 = smax.f32 %s477_s30, %s305_s5 }
 0x25e   : > { %s320_s7 = sadd.f32 1e-05, %s306_s6 }
 0x260   : > { %v321_v8 = vstv %s320_s7 }
 0x261   : > { %454 = vrsqrt.f32 %v321_v8 }
 0x267   : > { %v453_v9 = vpop.eup %452 }
 0x268   : > { %438 = vpush %v453_v9 }
 0x26b   : > { %v455_v10 = vpop.eup %454 }
 0x26c   : > { %440 = vpush %v455_v10 }
 0x299   : > { %s439_s8 = spop %438 }
 0x29a   : > { %v314_v16 = vstv %s439_s8 }
 0x29b   : > { %v315_v17 = vmul.f32 %v314_v16, %v308_v2  ;;  %v316_v18 = vmul.f32 %v314_v16, %v309_v3 }
 0x29d   : > { %s441_s11 = spop %440 }
 0x29e   : > { %v324_v11 = vstv %s441_s11 }
 0x29f   : > { %v325_v12 = vmul.f32 %v324_v11, %v318_v5  ;;  %v326_v13 = vmul.f32 %v324_v11, %v319_v6 }
 0x2a1   : > { %v410_v14 = vmul.f32 -1.442695, %v325_v12  ;;  %v411_v15 = vmul.f32 -1.442695, %v326_v13 }
 0x2a3   : > { %456 = vpow2.f32 %v410_v14 }
 0x2a4   : > { %458 = vpow2.f32 %v411_v15 }
 0x2a5   : > { %460 = vtanh.f32 %v315_v17 }
 0x2a6   : > { %462 = vtanh.f32 %v316_v18 }
 0x2ad   : > { %v457_v19 = vpop.eup %456 }
 0x2ae   : > { %v459_v20 = vpop.eup %458  ;;  %v335_v21 = vadd.f32 1.0, %v457_v19 }
 0x2af   : > { %v336_v22 = vadd.f32 1.0, %v459_v20  ;;  %v461_v23 = vpop.eup %460 }
 0x2b0   : > { %464 = vrcp.f32 %v335_v21  ;;  %v463_v24 = vpop.eup %462 }
 0x2b1   : > { %466 = vrcp.f32 %v336_v22 }
 0x2ba   : > { %v465_v25 = vpop.eup %464 }
 0x2bb   : > { %v467_v26 = vpop.eup %466  ;;  %v341_v27 = vmul.f32 %v465_v25, %v461_v23 }
 0x2bc   : > { %v342_v28 = vmul.f32 %v467_v26, %v463_v24 }
 0x2bd   : > { %343 = vst [vmem:[%s143_s15] sm:$0xff] %v341_v27 }
 0x2be   : > { %344 = vst [vmem:[%s143_s15 + $0x8] sm:$0xff] %v342_v28 }
 0x2bf PF: > { %s12_s9 = sadd.s32 1, %s474_s9  }
 0x2c0   : > { %p9_p4 = scmp.ge.s32.totalorder %s12_s9, 4  }
 0x2c2   :  { %11 = sbr.rel (!%p9_p4) target bundleno = 1 (0x1), region = 58 }

</bundles_post_ra>
